<compile_context>
chip_gen: v7x
topology: tpu7x:2x2x1
jax: 0.10.0
libtpu: 0.0.40
codegen_flags: <defaults>
</compile_context>

<pallas_src>
import functools

import jax
import jax.numpy as jnp
from jax.experimental import pallas as pl
from jax.experimental.pallas import tpu as pltpu


def _round_up(x: int, m: int) -> int:
    return ((x + m - 1) // m) * m


def _aggregation_kernel(seg_ref, h_ref, w_ref, o_ref, acc_ref, ids_ref, *,
                        n_nodes, node_tile, tiles_per_core, needs_tail_mask):
    c = pl.program_id(0)          # core-split axis ("parallel")
    k = pl.program_id(1)          # node-tile reduction axis ("arbitrary")

    @pl.when(k == 0)
    def _init():
        acc_ref[...] = jnp.zeros_like(acc_ref)
        # Hoisted graph-id iota: built once per core, reused every tile so the
        # per-tile one-hot build is just compare + cast.
        ids_ref[...] = jax.lax.broadcasted_iota(jnp.int32, ids_ref.shape, 0)

    # (B_pad, TN) one-hot membership selector built on-chip from streamed ids.
    one_hot = (seg_ref[...] == ids_ref[...]).astype(jnp.float32)

    h_tile = h_ref[...]
    if needs_tail_mask:
        # The last (or duplicated) tile reads past the end of h; zero those
        # rows so out-of-bounds garbage (possibly NaN/Inf) never reaches the
        # accumulator.  `tile_idx` is the UNclamped global tile index.
        tile_idx = c * tiles_per_core + k
        row = jax.lax.broadcasted_iota(jnp.int32, (node_tile, 1), 0)
        valid = (row + tile_idx * node_tile) < n_nodes
        h_tile = jnp.where(valid, h_tile, jnp.zeros_like(h_tile))

    # Pool-accumulate this node tile on the MXU (f32 accumulate in VMEM).
    acc_ref[...] += jnp.dot(one_hot, h_tile.astype(jnp.float32),
                            preferred_element_type=jnp.float32)

    @pl.when(k == tiles_per_core - 1)
    def _finalize():
        # Per-core partial projection of the un-normalized pooled sums.
        # 1/count scaling, bias, and the cross-core sum happen outside.
        o_ref[...] = jnp.dot(acc_ref[...], w_ref[...],
                             preferred_element_type=jnp.float32
                             ).astype(o_ref.dtype)


def aggregation_forward(h, segment_ids, counts, w, b, *, node_tile=1024):
    """dgl.mean_nodes-style per-graph mean pooling followed by Linear.

    h:           (N, F_in)  node features (streamed in native dtype, no copy)
    segment_ids: (N,)       int graph id per node, values in [0, B)
    counts:      (B,)       node count per graph
    w:           (F_in, F_out)
    b:           (F_out,) or (1, F_out)
    returns:     (B, F_out) float32
    """
    N, F_in = h.shape
    F_out = w.shape[-1]
    B = int(counts.shape[0])

    B_pad = _round_up(max(B, 1), 8)
    F_out_pad = _round_up(F_out, 128)
    h_itemsize = jnp.dtype(h.dtype).itemsize

    # --- node tile: big (amortize per-step overhead), multiple of 256,
    #     capped so two h stream buffers stay within a ~16 MiB budget. ---
    h_stream_budget = 16 << 20
    cap_rows = max(256, ((h_stream_budget // (2 * F_in * h_itemsize)) // 256) * 256)
    tile = max(256, (min(node_tile, cap_rows) // 256) * 256)
    if N <= tile:
        TN, num_tiles = N, 1        # single full-extent block, nothing to mask
    else:
        TN, num_tiles = tile, pl.cdiv(N, tile)

    # --- split the node reduction across (up to) 2 TensorCores (v7x). ---
    num_cores = 2 if num_tiles >= 2 else 1
    tiles_per_core = pl.cdiv(num_tiles, num_cores)
    clamp_tiles = (num_cores * tiles_per_core != num_tiles)
    needs_tail_mask = (num_tiles * TN != N) or clamp_tiles

    # --- cheap O(N) / O(F) host prep; h itself is untouched. ---
    seg = jnp.reshape(segment_ids.astype(jnp.int32), (1, N))
    seg_len = num_tiles * TN
    if seg_len != N:
        seg = jnp.full((1, seg_len), -1, jnp.int32).at[:, :N].set(seg)

    w_f32 = w.astype(jnp.float32)
    if F_out_pad != F_out:
        w_p = jnp.zeros((F_in, F_out_pad), jnp.float32).at[:, :F_out].set(w_f32)
    else:
        w_p = w_f32

    # Duplicated tiles on the last core re-read the final real tile; their
    # contribution is zeroed by the in-kernel tail mask.
    last_tile = num_tiles - 1

    def _tile_of(c, k):
        t = c * tiles_per_core + k
        return jnp.minimum(t, last_tile) if clamp_tiles else t

    kernel = functools.partial(
        _aggregation_kernel,
        n_nodes=N, node_tile=TN, tiles_per_core=tiles_per_core,
        needs_tail_mask=needs_tail_mask)

    # --- computed VMEM budget (review item: no blanket 48 MiB request). ---
    def _pad_bytes(rows, cols, itemsize):
        return _round_up(rows, 16) * _round_up(cols, 128) * itemsize

    vmem_bytes = (
        2 * _pad_bytes(TN, F_in, h_itemsize)        # h stream (double-buffered)
        + 2 * _pad_bytes(1, TN, 4)                  # seg stream
        + 2 * _pad_bytes(F_in, F_out_pad, 4)        # resident W (count as 2 bufs)
        + 2 * _pad_bytes(B_pad, F_out_pad, 4)       # output block
        + _pad_bytes(B_pad, F_in, 4)                # f32 accumulator scratch
        + _pad_bytes(B_pad, TN, 4)                  # hoisted graph-id iota
        + (8 << 20))                                # compiler slack
    vmem_bytes = int(min(vmem_bytes, 96 << 20))

    out_padded = pl.pallas_call(
        kernel,
        out_shape=jax.ShapeDtypeStruct((num_cores * B_pad, F_out_pad),
                                       jnp.float32),
        grid=(num_cores, tiles_per_core),
        in_specs=[
            pl.BlockSpec((1, TN), lambda c, k: (0, _tile_of(c, k))),     # seg ids
            pl.BlockSpec((TN, F_in), lambda c, k: (_tile_of(c, k), 0)),  # h stream
            pl.BlockSpec((F_in, F_out_pad), lambda c, k: (0, 0)),        # W resident
        ],
        out_specs=pl.BlockSpec((B_pad, F_out_pad), lambda c, k: (c, 0)),
        scratch_shapes=[
            pltpu.VMEM((B_pad, F_in), jnp.float32),   # pooled-sum accumulator
            pltpu.VMEM((B_pad, TN), jnp.int32),       # hoisted graph-id iota
        ],
        compiler_params=pltpu.CompilerParams(
            dimension_semantics=("parallel", "arbitrary"),
            vmem_limit_bytes=vmem_bytes,
        ),
    )(seg, h, w_p)

    # Sum per-core partial projections, then mean-normalize and add the bias.
    partial = out_padded.reshape(num_cores, B_pad, F_out_pad).sum(axis=0)
    inv_counts = 1.0 / counts.astype(jnp.float32)
    bias = jnp.reshape(b, (1, -1)).astype(jnp.float32)
    return partial[:B, :F_out] * inv_counts[:, None] + bias


def _reference(h, seg, counts, w, b, num_graphs):
    pooled = jax.ops.segment_sum(h, seg, num_segments=num_graphs)
    pooled = pooled / counts[:, None].astype(h.dtype)
    return pooled @ w + jnp.reshape(b, (1, -1))


if __name__ == "__main__":
    key = jax.random.PRNGKey(0)
    k_h, k_w, k_b, k_rest = jax.random.split(key, 4)

    # ---- test 1: small batched graph (2 graphs, 5 + 11 nodes): single-tile path
    nodes_per_graph = (5, 11)
    B = len(nodes_per_graph)
    N = sum(nodes_per_graph)
    F_in, F_out = 32, 16
    h = jax.random.normal(k_h, (N, F_in), dtype=jnp.float32)
    w = jax.random.normal(k_w, (F_in, F_out), dtype=jnp.float32) / jnp.sqrt(F_in)
    b = jax.random.normal(k_b, (1, F_out), dtype=jnp.float32) * 0.01
    seg = jnp.concatenate(
        [jnp.full((n,), g, jnp.int32) for g, n in enumerate(nodes_per_graph)])
    counts = jnp.array(nodes_per_graph, jnp.float32)

    out = jax.block_until_ready(aggregation_forward(h, seg, counts, w, b))
    ref = _reference(h, seg, counts, w, b, B)
    assert out.shape == (B, F_out)
    assert jnp.allclose(out, ref, atol=1e-3, rtol=1e-3), \
        float(jnp.max(jnp.abs(out - ref)))

    # ---- test 2: multi-tile / 2-core path (tail mask + clamped duplicate tile)
    nodes_per_graph2 = (200, 180, 320)       # N = 700 -> 3 tiles of 256, 2 x 2 grid
    B2 = len(nodes_per_graph2)
    N2 = sum(nodes_per_graph2)
    F_in2, F_out2 = 48, 20
    k_h2, k_w2, k_b2 = jax.random.split(k_rest, 3)
    h2 = jax.random.normal(k_h2, (N2, F_in2), dtype=jnp.float32)
    w2 = jax.random.normal(k_w2, (F_in2, F_out2), dtype=jnp.float32) / jnp.sqrt(F_in2)
    b2 = jax.random.normal(k_b2, (1, F_out2), dtype=jnp.float32) * 0.01
    seg2 = jnp.concatenate(
        [jnp.full((n,), g, jnp.int32) for g, n in enumerate(nodes_per_graph2)])
    counts2 = jnp.array(nodes_per_graph2, jnp.float32)

    out2 = jax.block_until_ready(
        aggregation_forward(h2, seg2, counts2, w2, b2, node_tile=256))
    ref2 = _reference(h2, seg2, counts2, w2, b2, B2)
    assert out2.shape == (B2, F_out2)
    assert jnp.allclose(out2, ref2, atol=1e-3, rtol=1e-3), \
        float(jnp.max(jnp.abs(out2 - ref2)))

    print("KERNEL_OK")
</pallas_src>

<mosaic_0001>
module attributes {stable_mosaic.version = 11 : i64} {
  func.func @_aggregation_kernel(%arg0: i32, %arg1: i32, %arg2: memref<1x16xi32, #tpu.memory_space<vmem>>, %arg3: memref<16x32xf32, #tpu.memory_space<vmem>>, %arg4: memref<32x128xf32, #tpu.memory_space<vmem>>, %arg5: memref<8x128xf32, #tpu.memory_space<vmem>>, %arg6: memref<8x32xf32, #tpu.memory_space<vmem>>, %arg7: memref<8x16xi32, #tpu.memory_space<vmem>>) attributes {dimension_semantics = [#tpu.dimension_semantics<parallel>, #tpu.dimension_semantics<arbitrary>], iteration_bounds = array<i64: 1, 1>, scalar_prefetch = 0 : i64, scratch_operands = 2 : i64, tpu.core_type = #tpu.core_type<tc>, window_params = [{transform_indices = @transform_0, window_bounds = array<i64: 1, 16>}, {transform_indices = @transform_1, window_bounds = array<i64: 16, 32>}, {pipeline_mode = #tpu.pipeline_mode<synchronous>, transform_indices = @transform_2, window_bounds = array<i64: 32, 128>}, {transform_indices = @transform_3, window_bounds = array<i64: 8, 128>}]} {
    %c0_i32 = arith.constant 0 : i32
    %0 = arith.cmpi eq, %arg1, %c0_i32 : i32
    %1 = arith.extui %0 : i1 to i32
    %c0_i32_0 = arith.constant 0 : i32
    %2 = arith.cmpi ne, %1, %c0_i32_0 : i32
    scf.if %2 {
      %cst_12 = arith.constant 0.000000e+00 : f32
      %17 = vector.broadcast %cst_12 : f32 to vector<8x32xf32>
      %c0_13 = arith.constant 0 : index
      %c0_14 = arith.constant 0 : index
      %18 = vector.load %arg6[%c0_13, %c0_14] : memref<8x32xf32, #tpu.memory_space<vmem>>, vector<8x32xf32>
      tpu.vector_store %arg6[%c0_13, %c0_14], %17 {strides = array<i32>} : memref<8x32xf32, #tpu.memory_space<vmem>>, vector<8x32xf32>,
      %19 = tpu.iota {dimensions = array<i32: 0>} : vector<8x16xi32>
      %c0_15 = arith.constant 0 : index
      %c0_16 = arith.constant 0 : index
      %20 = vector.load %arg7[%c0_15, %c0_16] : memref<8x16xi32, #tpu.memory_space<vmem>>, vector<8x16xi32>
      tpu.vector_store %arg7[%c0_15, %c0_16], %19 {strides = array<i32>} : memref<8x16xi32, #tpu.memory_space<vmem>>, vector<8x16xi32>,
    } else {
    }
    %c0 = arith.constant 0 : index
    %c0_1 = arith.constant 0 : index
    %3 = vector.load %arg2[%c0, %c0_1] : memref<1x16xi32, #tpu.memory_space<vmem>>, vector<1x16xi32>
    %c0_2 = arith.constant 0 : index
    %c0_3 = arith.constant 0 : index
    %4 = vector.load %arg7[%c0_2, %c0_3] : memref<8x16xi32, #tpu.memory_space<vmem>>, vector<8x16xi32>
    %5 = vector.broadcast %3 : vector<1x16xi32> to vector<8x16xi32>
    %6 = arith.cmpi eq, %5, %4 : vector<8x16xi32>
    %7 = arith.extui %6 : vector<8x16xi1> to vector<8x16xi32>
    %8 = arith.sitofp %7 : vector<8x16xi32> to vector<8x16xf32>
    %c0_4 = arith.constant 0 : index
    %c0_5 = arith.constant 0 : index
    %9 = vector.load %arg3[%c0_4, %c0_5] : memref<16x32xf32, #tpu.memory_space<vmem>>, vector<16x32xf32>
    %c0_6 = arith.constant 0 : index
    %c0_7 = arith.constant 0 : index
    %10 = vector.load %arg6[%c0_6, %c0_7] : memref<8x32xf32, #tpu.memory_space<vmem>>, vector<8x32xf32>
    %cst = arith.constant dense<0.000000e+00> : vector<8x32xf32>
    %11 = tpu.matmul %8, %9, %cst {dimension_numbers = #tpu.dot_dimension_numbers<[1], [0], [0], [1], [0, 0, 1, 1], [], []>} : vector<8x16xf32>, vector<16x32xf32>, vector<8x32xf32> -> vector<8x32xf32>
    %12 = arith.addf %10, %11 : vector<8x32xf32>
    %c0_8 = arith.constant 0 : index
    %c0_9 = arith.constant 0 : index
    %13 = vector.load %arg6[%c0_8, %c0_9] : memref<8x32xf32, #tpu.memory_space<vmem>>, vector<8x32xf32>
    tpu.vector_store %arg6[%c0_8, %c0_9], %12 {strides = array<i32>} : memref<8x32xf32, #tpu.memory_space<vmem>>, vector<8x32xf32>,
    %c0_i32_10 = arith.constant 0 : i32
    %14 = arith.cmpi eq, %arg1, %c0_i32_10 : i32
    %15 = arith.extui %14 : i1 to i32
    %c0_i32_11 = arith.constant 0 : i32
    %16 = arith.cmpi ne, %15, %c0_i32_11 : i32
    scf.if %16 {
      %c0_12 = arith.constant 0 : index
      %c0_13 = arith.constant 0 : index
      %17 = vector.load %arg6[%c0_12, %c0_13] : memref<8x32xf32, #tpu.memory_space<vmem>>, vector<8x32xf32>
      %c0_14 = arith.constant 0 : index
      %c0_15 = arith.constant 0 : index
      %18 = vector.load %arg4[%c0_14, %c0_15] : memref<32x128xf32, #tpu.memory_space<vmem>>, vector<32x128xf32>
      %cst_16 = arith.constant dense<0.000000e+00> : vector<8x128xf32>
      %19 = tpu.matmul %17, %18, %cst_16 {dimension_numbers = #tpu.dot_dimension_numbers<[1], [0], [0], [1], [0, 0, 1, 1], [], []>} : vector<8x32xf32>, vector<32x128xf32>, vector<8x128xf32> -> vector<8x128xf32>
      %c0_17 = arith.constant 0 : index
      %c0_18 = arith.constant 0 : index
      %20 = vector.load %arg5[%c0_17, %c0_18] : memref<8x128xf32, #tpu.memory_space<vmem>>, vector<8x128xf32>
      tpu.vector_store %arg5[%c0_17, %c0_18], %19 {strides = array<i32>} : memref<8x128xf32, #tpu.memory_space<vmem>>, vector<8x128xf32>,
    } else {
    }
    return
  }
  func.func @transform_0(%arg0: i32, %arg1: i32) -> (i32, i32) {
    %c1_i32 = arith.constant 1 : i32
    %0 = arith.muli %arg0, %c1_i32 : i32
    %1 = arith.addi %0, %arg1 : i32
    %c0_i32 = arith.constant 0 : i32
    %c0_i32_0 = arith.constant 0 : i32
    return %c0_i32, %1 : i32, i32
  }
  func.func @transform_1(%arg0: i32, %arg1: i32) -> (i32, i32) {
    %c1_i32 = arith.constant 1 : i32
    %0 = arith.muli %arg0, %c1_i32 : i32
    %1 = arith.addi %0, %arg1 : i32
    %c0_i32 = arith.constant 0 : i32
    %c0_i32_0 = arith.constant 0 : i32
    return %1, %c0_i32 : i32, i32
  }
  func.func @transform_2(%arg0: i32, %arg1: i32) -> (i32, i32) {
    %c0_i32 = arith.constant 0 : i32
    %c0_i32_0 = arith.constant 0 : i32
    %c0_i32_1 = arith.constant 0 : i32
    return %c0_i32, %c0_i32_0 : i32, i32
  }
  func.func @transform_3(%arg0: i32, %arg1: i32) -> (i32, i32) {
    %c0_i32 = arith.constant 0 : i32
    %c0_i32_0 = arith.constant 0 : i32
    return %arg0, %c0_i32 : i32, i32
  }
}

</mosaic_0001>

<bundles_post_ra>
// kernel: tpu_custom_call.1
= control target key start
LH: loop header
LB: loop body
LE: loop exit
PB: predicated region body
PF: predicated region fallthrough
CT: control target
= control target key end

     0   :  { %8 = vsyncpa [#allocation5], 0  ;;  %s489_s0 = inlined_call_operand.hbm [shape: s32[1,16], index: 0, kind: input, shape index: {}]   ;;  %s490_s1 = inlined_call_operand.hbm [shape: f32[16,32], index: 1, kind: input, shape index: {}]   ;;  %s491_s2 = inlined_call_operand.hbm [shape: f32[32,128], index: 2, kind: input, shape index: {}]   ;;  %s492_s3 = inlined_call_operand.hbm [shape: f32[8,128], index: 3, kind: output, shape index: {}]  }
   0x1   :  { %9 = vsyncpa [#allocation8], 0 }
   0x2   :  { %10 = vsyncpa [#allocation6], 0  ;;  %s403_s12 = smov [#allocation7]   ;;  %s309_s16 = scalar_lea.hbm %s490_s1, 256 }
   0x3   :  { %s33_s13 = sshll.u32 %s403_s12, 4  ;;  %p310_p0 = scmp.ne.s32.totalorder %s490_s1, %s309_s16  ;;  %s34_s13 = int_to_ptr.vmem [resolvable:$true] %s33_s13 }
   0x4   :  { %p313_p1 = scmp.lt.u32.totalorder %s309_s16, %s490_s1 }
   0x6   :  { %p315_p2 = pnand %p313_p1, %p310_p0 }
   0x8   :  { %318 = shalt.err (!%p315_p2)
}
   0x9   :  { %s319_s21 = scalar_lea.vmem %s34_s13, 256  ;;  %p324_p4 = scmp.lt.s32.totalorder %s34_s13, %s34_s13 }
   0xa   :  { %p320_p3 = scmp.ne.s32.totalorder %s34_s13, %s319_s21  ;;  %p325_p5 = scmp.lt.s32.totalorder %s319_s21, %s319_s21 }
   0xc   :  { %p326_p6 = por %p325_p5, %p324_p4 }
   0xe   :  { %p327_p7 = pnand %p326_p6, %p320_p3 }
  0x10   :  { %330 = shalt.err (!%p327_p7)
}
  0x11   :  { %s404_s22 = smov 128   ;;  %s405_s23 = smov 8  }
  0x12   :  { %39 = dma.hbm_to_vmem [thread:$0]  %s490_s1, 256, %s34_s13, [#allocation8], %s404_s22, %s404_s22, %s405_s23  }
  0x13   :  { %s406_s26 = smov [#allocation4]   ;;  %s407_s28 = smov [#allocation9]  }
  0x14   :  { %s20_s27 = sshll.u32 %s406_s26, 4  ;;  %s45_s29 = sshll.u32 %s407_s28, 4  ;;  %s21_s27 = int_to_ptr.vmem [resolvable:$true] %s20_s27  ;;  %s46_s29 = int_to_ptr.vmem [resolvable:$true] %s45_s29 }
  0x15   :  { %s331_s5 = scalar_lea.hbm %s489_s0, 16 }
  0x16   :  { %p332_p8 = scmp.ne.s32.totalorder %s489_s0, %s331_s5  ;;  %p335_p9 = scmp.lt.u32.totalorder %s331_s5, %s489_s0 }
  0x18   :  { %p337_p10 = pnand %p335_p9, %p332_p8 }
  0x1a   :  { %340 = shalt.err (!%p337_p10)
}
  0x1b   :  { %s341_s1 = scalar_lea.vmem %s21_s27, 16  ;;  %s345_s10 = scalar_lea.vmem %s21_s27, 32 }
  0x1c   :  { %p342_p11 = scmp.ne.s32.totalorder %s21_s27, %s341_s1  ;;  %p346_p12 = scmp.lt.s32.totalorder %s21_s27, %s21_s27 }
  0x1d   :  { %p347_p13 = scmp.lt.s32.totalorder %s345_s10, %s341_s1 }
  0x1f   :  { %p348_p0 = por %p347_p13, %p346_p12 }
  0x21   :  { %p349_p1 = pnand %p348_p0, %p342_p11 }
  0x23   :  { %352 = shalt.err (!%p349_p1)
}
  0x24   :  { %23 = dma.hbm_to_vmem [thread:$0]  %s489_s0, 16, %s21_s27, [#allocation5]  }
  0x25   :  { %s353_s15 = scalar_lea.hbm %s491_s2, 512 }
  0x26   :  { %p354_p2 = scmp.ne.s32.totalorder %s491_s2, %s353_s15  ;;  %p357_p3 = scmp.lt.u32.totalorder %s353_s15, %s491_s2 }
  0x28   :  { %p359_p4 = pnand %p357_p3, %p354_p2 }
  0x2a   :  { %362 = shalt.err (!%p359_p4)
}
  0x2b   :  { %s363_s20 = scalar_lea.vmem %s46_s29, 512  ;;  %p368_p6 = scmp.lt.s32.totalorder %s46_s29, %s46_s29 }
  0x2c   :  { %p364_p5 = scmp.ne.s32.totalorder %s46_s29, %s363_s20  ;;  %p369_p7 = scmp.lt.s32.totalorder %s363_s20, %s363_s20 }
  0x2e   :  { %p370_p8 = por %p369_p7, %p368_p6 }
  0x30   :  { %p371_p9 = pnand %p370_p8, %p364_p5 }
  0x32   :  { %374 = shalt.err (!%p371_p9)
}
  0x33   :  { %51 = dma.hbm_to_vmem [thread:$0]  %s491_s2, 512, %s46_s29, [#allocation8], %s404_s22, %s404_s22, %s405_s23  }
  0x34   :  { %397 = dma.done.wait [#allocation5], 16  }
  0x35   :  { %398 = vsyncadd [#allocation5], 4294967280 }
  0x36   :  { %399 = dma.done.wait [#allocation8], 768  }
  0x37   :  { %400 = vsyncadd [#allocation8], 4294966528  ;;  %v70_v0 = vlaneseq  ;;  %v408_v1 = vmov 0.0|0.0   ;;  %vm409_vm0 = vmmov 0   ;;  %v410_v2 = vmov 0.0   ;;  %v83_v4 = vld [vmem:[#allocation7] sm:$0xff] }
  0x38   :  { %291 = vmatprep.subr.bf16.mxu0 %v408_v1  ;;  %277 = vmatprep.mubr.msk.f32.mxu0 %vm409_vm0, %v410_v2  ;;  %vm72_vm1 = vcmask 130048   ;;  %vm68_vm2 = vcmask 261120   ;;  %v84_v5 = vld [vmem:[#allocation7 + $0x8] sm:$0xff]  ;;  %v261_v7 = vld [vmem:[#allocation4] ss:$0 sm:$0xff]  ;;  %v167_v10 = vld [vmem:[#allocation9] sm:$0xff] }
  0x39   :  { %v71_v3 = vshrl.u32 %v70_v0, 7  ;;  %69 = vst.msk [vmem:[#allocation2] sm:$0xff] %vm68_vm2, %v410_v2  ;;  %294 = vmatprep.subr.bf16.mxu1 %v408_v1  ;;  %288 = vmatprep.mubr.msk.f32.mxu1 %vm409_vm0, %v410_v2  ;;  %v292_v6 = vpack.c.bf16 %v84_v5, %v83_v4  ;;  %v168_v11 = vld [vmem:[#allocation9 + $0x8] sm:$0xff]  ;;  %v169_v13 = vld [vmem:[#allocation9 + $0x10] sm:$0xff]  ;;  %v170_v14 = vld [vmem:[#allocation9 + $0x18] sm:$0xff]  ;;  %s411_s2 = smov [#allocation10]  }
  0x3a   :  { %v295_v12 = vpack.c.bf16 %v168_v11, %v167_v10  ;;  %v298_v15 = vpack.c.bf16 %v170_v14, %v169_v13  ;;  %s251_s22 = sshll.u32 %s411_s2, 4  ;;  %s252_s22 = int_to_ptr.vmem [resolvable:$true] %s251_s22 }
  0x3b   :  { %73 = vst.msk [vmem:[#allocation3] sm:$0xff] %vm72_vm1, %v71_v3  ;;  %293 = vmatpush3.bf16.msra.mxu0 %v292_v6  ;;  %s375_s23 = scalar_lea.vmem %s252_s22, 128  ;;  %p380_p11 = scmp.lt.s32.totalorder %s252_s22, %s252_s22 }
  0x3c   :  { %296 = vmatpush3.bf16.msra.mxu1 %v295_v12  ;;  %p376_p10 = scmp.ne.s32.totalorder %s252_s22, %s375_s23  ;;  %p381_p12 = scmp.lt.s32.totalorder %s375_s23, %s375_s23 }
  0x3d   :  { %297 = vmatprep.subr.bf16.mxu1 %v408_v1 }
  0x3e   :  { %p382_p13 = por %p381_p12, %p380_p11 }
  0x40   :  { %299 = vmatpush3.bf16.msra.mxu1 %v298_v15  ;;  %v85_v16 = vld [vmem:[#allocation2] sm:$0xff]  ;;  %p383_p0 = pnand %p382_p13, %p376_p10 }
  0x42   :  { %v75_v8 = vld [vmem:[#allocation3] sm:$0xff] }
  0x43   :  { %vm80_vm3 = vcmp.eq.s32.totalorder %v261_v7, %v75_v8 }
  0x44   :  { %v262_v9 = vsel %vm80_vm3, 1.0, %v410_v2 }
  0x45   :  { %278 = vmatmul.mubr.msk.f32.vlgmr.msra.gmra.mrb[0].mxu0 %vm72_vm1, %v262_v9 }
 0x118   :  { %v156_v17 = vpop.f32.mrb[0].mxu0 }
 0x119   :  { %v160_v18 = vadd.f32 %v156_v17, %v85_v16  ;;  %v279_v19 = vpop.f32.mrb[1].mxu0 }
 0x11b   :  { %162 = vst.msk [vmem:[#allocation2] sm:$0xff] %vm68_vm2, %v160_v18 }
 0x122   :  { %v166_v20 = vld [vmem:[#allocation2] sm:$0xff] }
 0x123   :  { %289 = vmatmul.mubr.msk.f32.vlgmr.msra.gmra.mrb[0].mxu1 %vm68_vm2, %v166_v20 }
 0x1f6   :  { %v240_v21 = vpop.f32.mrb[0].mxu1 }
 0x1f7   :  { %244 = vst [vmem:[#allocation10] sm:$0xff] %v240_v21  ;;  %v290_v22 = vpop.f32.mrb[1].mxu1 }
 0x1f8   :  { %386 = shalt.err (!%p383_p0)
}
 0x1f9   :  { %s387_s26 = scalar_lea.hbm %s492_s3, 128 }
 0x1fa   :  { %p388_p1 = scmp.ne.s32.totalorder %s492_s3, %s387_s26  ;;  %p391_p2 = scmp.lt.u32.totalorder %s387_s26, %s492_s3 }
 0x1fc   :  { %p393_p3 = pnand %p391_p2, %p388_p1 }
 0x1fe   :  { %396 = shalt.err (!%p393_p3)
}
 0x1ff   :  { %254 = dma.vmem_to_hbm [thread:$0]  %s252_s22, 128, %s492_s3, [#allocation6]  }
 0x200   :  { %401 = dma.done.wait [#allocation6], 128  }
 0x201   :  { %402 = vsyncadd [#allocation6], 4294967168 }
 0x202   :  { %258 = vsyncpa [#allocation5], 1 }
 0x203   :  { %259 = vsyncpa [#allocation8], 1 }
 0x204   :  { %260 = vsyncpa [#allocation6], 1 }

</bundles_post_ra>
